<compile_context>
chip_gen: v6e
topology: v6e:2x2x1
jax: 0.10.0
libtpu: 0.0.40
codegen_flags: <defaults>
</compile_context>

<pallas_src>
import math

import jax
import jax.numpy as jnp
from jax import lax
from jax.experimental import pallas as pl
from jax.experimental.pallas import tpu as pltpu

_EPS2 = 1e-24  # (1e-12)^2 -> rsqrt(max(sumsq, eps^2)) == 1/max(norm, 1e-12)
_VMEM_LIMIT = 48 * 1024 * 1024    # requested scoped VMEM (headroom on v7x 64MiB/TC)
_VMEM_BUDGET = 30 * 1024 * 1024   # target working set when picking tile sizes


def _round_up(x, m):
    return ((x + m - 1) // m) * m


# ----------------------------------------------------------------------------
# Stage 1: one-time weight prep (normalize rows, fold scale, transpose).
# ----------------------------------------------------------------------------
def _prep_weight_kernel(w_ref, scale_ref, wt_ref):
    # w_ref: (to_prep, D); scale_ref: (1, 1) in SMEM; wt_ref: (D, to_prep).
    w = w_ref[...].astype(jnp.float32)
    inv = lax.rsqrt(jnp.maximum(jnp.sum(w * w, axis=-1, keepdims=True),
                                jnp.float32(_EPS2)))
    wn = w * inv * scale_ref[0, 0]
    wt_ref[...] = wn.T.astype(wt_ref.dtype)


def prepare_normalized_weight(weight, scale, *, mxu_dtype=jnp.bfloat16):
    """Normalized + scale-folded + transposed weight, shape (D, round_up(O,128)).

    Cache the result across forward calls when weights are static (inference).
    """
    O, D = weight.shape
    O_pad = _round_up(O, 128)
    w = weight
    if O_pad != O:
        w = jnp.pad(w, ((0, O_pad - O), (0, 0)))
    scale2 = jnp.asarray(scale, jnp.float32).reshape(1, 1)

    # Keep the prep tile modest so the f32 tile + its transpose fit VMEM even
    # for wide D; 128 always divides O_pad.
    to_prep = 256 if (256 * D * 4 <= 4 * 1024 * 1024 and O_pad % 256 == 0) else 128
    to_prep = min(to_prep, O_pad)

    return pl.pallas_call(
        _prep_weight_kernel,
        out_shape=jax.ShapeDtypeStruct((D, O_pad), mxu_dtype),
        grid=(O_pad // to_prep,),
        in_specs=[
            pl.BlockSpec((to_prep, D), lambda j: (j, 0)),          # weight tile
            pl.BlockSpec(memory_space=pltpu.MemorySpace.SMEM),     # scale scalar
        ],
        out_specs=pl.BlockSpec((D, to_prep), lambda j: (0, j)),
        compiler_params=pltpu.CompilerParams(
            dimension_semantics=("parallel",),
            vmem_limit_bytes=_VMEM_LIMIT,
        ),
    )(w, scale2)


# ----------------------------------------------------------------------------
# Stage 1b (w-resident path only): normalize x rows once, emit bf16.
# ----------------------------------------------------------------------------
def _normalize_rows_kernel(x_ref, xn_ref):
    x = x_ref[...].astype(jnp.float32)
    inv = lax.rsqrt(jnp.maximum(jnp.sum(x * x, axis=-1, keepdims=True),
                                jnp.float32(_EPS2)))
    xn_ref[...] = (x * inv).astype(xn_ref.dtype)


# ----------------------------------------------------------------------------
# Stage 2: streaming normalized matmul (two grid orders).
# ----------------------------------------------------------------------------
def _matmul_x_resident_kernel(x_ref, wt_ref, bias_ref, o_ref, xn_ref):
    # Grid = (row tiles i [parallel, outer], col tiles j [arbitrary, inner]).
    # The x tile stays resident across j; normalize it exactly once per i.
    @pl.when(pl.program_id(1) == 0)
    def _():
        x = x_ref[...].astype(jnp.float32)
        inv = lax.rsqrt(jnp.maximum(jnp.sum(x * x, axis=-1, keepdims=True),
                                    jnp.float32(_EPS2)))
        xn_ref[...] = (x * inv).astype(xn_ref.dtype)

    out = jnp.dot(xn_ref[...], wt_ref[...], preferred_element_type=jnp.float32)
    o_ref[...] = (out + bias_ref[...]).astype(o_ref.dtype)


def _matmul_w_resident_kernel(xn_ref, wt_ref, bias_ref, o_ref):
    # Grid = (col tiles j [parallel, outer], row tiles i [arbitrary, inner]).
    # x was pre-normalized to bf16; the weight tile stays resident across i.
    out = jnp.dot(xn_ref[...], wt_ref[...], preferred_element_type=jnp.float32)
    o_ref[...] = (out + bias_ref[...]).astype(o_ref.dtype)


# ----------------------------------------------------------------------------
# Tile-size selection helpers.
# ----------------------------------------------------------------------------
def _fit_tiles_for_vmem(tm, to, D, out_bytes):
    """Shrink (tm, to) until the stage-2 working set fits the VMEM budget."""
    def est(a, b):
        return (2 * a * D * 4            # x tile, double-buffered (f32)
                + a * D * 2              # xn scratch / bf16 staging
                + a * D * 4              # f32 temporaries over the x tile
                + 2 * D * b * 2          # wt tile, double-buffered (bf16)
                + 2 * a * b * out_bytes  # output tile, double-buffered
                + a * b * 4)             # f32 matmul result
    while est(tm, to) > _VMEM_BUDGET:
        if tm > 256:
            tm //= 2
        elif to > 128:
            to //= 2
        elif tm > 8:
            tm //= 2
        else:
            break
    return tm, to


def _pick_row_tile(M8, tm_cap):
    """Largest multiple of 8 <= tm_cap dividing M8 (no padding); else pad."""
    tm_cap = max(8, (min(tm_cap, M8) // 8) * 8)
    t = tm_cap
    while t >= 8 and M8 % t != 0:
        t -= 8
    if t >= min(tm_cap, 64):
        return t, M8                          # no row padding needed
    return tm_cap, _round_up(M8, tm_cap)      # pad rows up to a tile multiple


def _pick_col_tile(O_pad, to_cap):
    to_cap = max(128, (min(to_cap, O_pad) // 128) * 128)
    t = to_cap
    while t > 128 and O_pad % t != 0:
        t -= 128
    return t


# ----------------------------------------------------------------------------
# Public wrapper.
# ----------------------------------------------------------------------------
def normalized_linear(x, weight, scale, bias, *, tm=512, to=512,
                      mxu_dtype=jnp.bfloat16, out_dtype=None,
                      prepared_wt=None, force_path=None):
    """x: (..., D), weight: (O, D), scale: (1,), bias: (O,) -> (..., O).

    `prepared_wt` (from prepare_normalized_weight) hoists the one-time weight
    prep out of the per-call path for static weights.  `out_dtype` may be set
    to bf16 to halve output writeback if downstream tolerates it.
    """
    orig_shape = x.shape
    D = orig_shape[-1]
    O, Dw = weight.shape
    assert Dw == D, "weight in_features must match x last dim"
    out_dtype = x.dtype if out_dtype is None else out_dtype
    out_bytes = jnp.dtype(out_dtype).itemsize

    x2 = x.reshape(-1, D)
    M = x2.shape[0]
    O_pad = _round_up(O, 128)

    # Stage 1 (one-time when cached by the caller).
    wt = (prepared_wt if prepared_wt is not None
          else prepare_normalized_weight(weight, scale, mxu_dtype=mxu_dtype))
    assert wt.shape == (D, O_pad)

    b = bias.reshape(1, O).astype(jnp.float32)
    if O_pad != O:
        b = jnp.pad(b, ((0, 0), (0, O_pad - O)))

    # Tile sizes: as large as the VMEM budget allows, snapped to the problem.
    tm_fit, to_fit = _fit_tiles_for_vmem(max(tm, 8), max(to, 128), D, out_bytes)
    M8 = _round_up(M, 8)
    tm_eff, M_pad = _pick_row_tile(M8, tm_fit)
    to_eff = _pick_col_tile(O_pad, to_fit)

    if M_pad != M:
        # Zero rows normalize to zero, so padding cannot inject NaN/Inf.
        x2 = jnp.pad(x2, ((0, M_pad - M), (0, 0)))

    n_i = M_pad // tm_eff
    n_j = O_pad // to_eff

    # Path choice by HBM traffic (the binding resource for this op):
    #   x-resident: x read once (f32), wt re-read per row tile (bf16).
    #   w-resident: xn pre-normalized to bf16 (write + n_j reads), wt read once.
    t_x_res = M_pad * D * 4 + n_i * O_pad * D * 2
    t_w_res = (M_pad * D * 4 + M_pad * D * 2 + n_j * M_pad * D * 2
               + O_pad * D * 2)
    path = force_path or ("x_resident" if t_x_res <= t_w_res else "w_resident")

    cp = pltpu.CompilerParams(
        dimension_semantics=("parallel", "arbitrary"),
        vmem_limit_bytes=_VMEM_LIMIT,
    )

    if path == "x_resident":
        out = pl.pallas_call(
            _matmul_x_resident_kernel,
            out_shape=jax.ShapeDtypeStruct((M_pad, O_pad), out_dtype),
            grid=(n_i, n_j),
            in_specs=[
                pl.BlockSpec((tm_eff, D), lambda i, j: (i, 0)),   # x (resident over j)
                pl.BlockSpec((D, to_eff), lambda i, j: (0, j)),   # wt (streamed)
                pl.BlockSpec((1, to_eff), lambda i, j: (0, j)),   # bias
            ],
            out_specs=pl.BlockSpec((tm_eff, to_eff), lambda i, j: (i, j)),
            scratch_shapes=[pltpu.VMEM((tm_eff, D), mxu_dtype)],  # cached xn
            compiler_params=cp,
        )(x2, wt, b)
    else:
        # Stage 1b: normalize x once, write bf16 (halves the re-read stream).
        xn = pl.pallas_call(
            _normalize_rows_kernel,
            out_shape=jax.ShapeDtypeStruct((M_pad, D), mxu_dtype),
            grid=(n_i,),
            in_specs=[pl.BlockSpec((tm_eff, D), lambda i: (i, 0))],
            out_specs=pl.BlockSpec((tm_eff, D), lambda i: (i, 0)),
            compiler_params=pltpu.CompilerParams(
                dimension_semantics=("parallel",),
                vmem_limit_bytes=_VMEM_LIMIT),
        )(x2)
        out = pl.pallas_call(
            _matmul_w_resident_kernel,
            out_shape=jax.ShapeDtypeStruct((M_pad, O_pad), out_dtype),
            grid=(n_j, n_i),
            in_specs=[
                pl.BlockSpec((tm_eff, D), lambda j, i: (i, 0)),   # xn (streamed bf16)
                pl.BlockSpec((D, to_eff), lambda j, i: (0, j)),   # wt (resident over i)
                pl.BlockSpec((1, to_eff), lambda j, i: (0, j)),   # bias
            ],
            out_specs=pl.BlockSpec((tm_eff, to_eff), lambda j, i: (i, j)),
            compiler_params=cp,
        )(xn, wt, b)

    out = out[:M, :O]
    return out.reshape(*orig_shape[:-1], O)


# ----------------------------------------------------------------------------
# Reference / parameter init.
# ----------------------------------------------------------------------------
def init_params(key, in_features, out_features):
    # kaiming_uniform_(a=sqrt(5)) on an (O, I) weight => U(-1/sqrt(I), 1/sqrt(I))
    bound = 1.0 / math.sqrt(in_features)
    weight = jax.random.uniform(
        key, (out_features, in_features), dtype=jnp.float32,
        minval=-bound, maxval=bound)
    scale = jnp.ones((1,), dtype=jnp.float32)
    bias = jnp.zeros((out_features,), dtype=jnp.float32)
    return weight, scale, bias


def reference(x, weight, scale, bias):
    eps = 1e-12
    xn = x / jnp.maximum(jnp.linalg.norm(x, axis=-1, keepdims=True), eps)
    wn = weight / jnp.maximum(jnp.linalg.norm(weight, axis=-1, keepdims=True), eps)
    return scale.reshape(()) * (xn @ wn.T) + bias


if __name__ == "__main__":
    key = jax.random.PRNGKey(0)
    k_w, k_x, k_w2, k_x2 = jax.random.split(key, 4)

    # Small shape matching the module's typical use (B, S, D) -> (B, S, O).
    batch, seq, in_features, out_features = 2, 8, 32, 32
    weight, scale, bias = init_params(k_w, in_features, out_features)
    x = jax.random.normal(k_x, (batch, seq, in_features), dtype=jnp.float32)

    out = jax.block_until_ready(normalized_linear(x, weight, scale, bias))
    ref = reference(x, weight, scale, bias)
    assert out.shape == (batch, seq, out_features)
    # bf16 MXU inputs (f32 accumulate): |cos sim| <= 1, so ~1e-3 abs error.
    assert jnp.allclose(out, ref, atol=2e-2, rtol=2e-2), "mismatch vs reference"

    # Second check: multiple row/col tiles + cached (hoisted) weight prep.
    batch2, seq2, in2, out2 = 4, 128, 128, 256
    weight2, scale2, bias2 = init_params(k_w2, in2, out2)
    scale2 = scale2 * 1.7
    bias2 = bias2 + 0.25
    x2 = jax.random.normal(k_x2, (batch2, seq2, in2), dtype=jnp.float32)

    wt2 = prepare_normalized_weight(weight2, scale2)
    o2 = jax.block_until_ready(
        normalized_linear(x2, weight2, scale2, bias2,
                          prepared_wt=wt2, tm=256, to=128))
    r2 = reference(x2, weight2, scale2, bias2)
    assert o2.shape == (batch2, seq2, out2)
    assert jnp.allclose(o2, r2, atol=2e-2, rtol=2e-2), "mismatch (x-resident)"

    # Exercise the w-resident (pre-normalized x) path as well.
    o3 = jax.block_until_ready(
        normalized_linear(x2, weight2, scale2, bias2, force_path="w_resident"))
    assert jnp.allclose(o3, r2, atol=2e-2, rtol=2e-2), "mismatch (w-resident)"

    print("KERNEL_OK")
</pallas_src>

<mosaic_0001>
module attributes {stable_mosaic.version = 11 : i64} {
  func.func @_prep_weight_kernel(%arg0: i32, %arg1: memref<128x32xf32, #tpu.memory_space<vmem>>, %arg2: memref<1x1xf32, #tpu.memory_space<smem>>, %arg3: memref<32x128xbf16, #tpu.memory_space<vmem>>) attributes {dimension_semantics = [#tpu.dimension_semantics<parallel>], iteration_bounds = array<i64: 1>, scalar_prefetch = 0 : i64, scratch_operands = 0 : i64, tpu.core_type = #tpu.core_type<tc>, window_params = [{transform_indices = @transform_0, window_bounds = array<i64: 128, 32>}, {transform_indices = @transform_1, window_bounds = array<i64: 1, 1>}, {transform_indices = @transform_2, window_bounds = array<i64: 32, 128>}]} {
    %c0 = arith.constant 0 : index
    %c0_0 = arith.constant 0 : index
    %0 = vector.load %arg1[%c0, %c0_0] : memref<128x32xf32, #tpu.memory_space<vmem>>, vector<128x32xf32>
    %1 = arith.mulf %0, %0 : vector<128x32xf32>
    %cst = arith.constant dense<0.000000e+00> : vector<128xf32>
    %2 = vector.multi_reduction <add>, %1, %cst [1] : vector<128x32xf32> to vector<128xf32>
    %3 = vector.shape_cast %2 : vector<128xf32> to vector<128x1xf32>
    %cst_1 = arith.constant 1.000000e-24 : f32
    %4 = vector.broadcast %cst_1 : f32 to vector<128x1xf32>
    %5 = arith.maximumf %3, %4 : vector<128x1xf32>
    %6 = math.rsqrt %5 : vector<128x1xf32>
    %7 = vector.broadcast %6 : vector<128x1xf32> to vector<128x32xf32>
    %8 = arith.mulf %0, %7 : vector<128x32xf32>
    %c0_2 = arith.constant 0 : index
    %c0_3 = arith.constant 0 : index
    %9 = memref.load %arg2[%c0_2, %c0_3] : memref<1x1xf32, #tpu.memory_space<smem>>
    %10 = vector.broadcast %9 : f32 to vector<128x32xf32>
    %11 = arith.mulf %8, %10 : vector<128x32xf32>
    %12 = tpu.transpose %11, [1, 0] : vector<128x32xf32> -> vector<32x128xf32>
    %13 = arith.truncf %12 : vector<32x128xf32> to vector<32x128xbf16>
    %c0_4 = arith.constant 0 : index
    %c0_5 = arith.constant 0 : index
    %14 = vector.load %arg3[%c0_4, %c0_5] : memref<32x128xbf16, #tpu.memory_space<vmem>>, vector<32x128xbf16>
    tpu.vector_store %arg3[%c0_4, %c0_5], %13 {strides = array<i32>} : memref<32x128xbf16, #tpu.memory_space<vmem>>, vector<32x128xbf16>,
    return
  }
  func.func @transform_0(%arg0: i32) -> (i32, i32) {
    %c0_i32 = arith.constant 0 : i32
    %c0_i32_0 = arith.constant 0 : i32
    return %arg0, %c0_i32 : i32, i32
  }
  func.func @transform_1(%arg0: i32) -> (i32, i32) {
    %c0_i32 = arith.constant 0 : i32
    %c0_i32_0 = arith.constant 0 : i32
    %c0_i32_1 = arith.constant 0 : i32
    return %c0_i32, %c0_i32_0 : i32, i32
  }
  func.func @transform_2(%arg0: i32) -> (i32, i32) {
    %c0_i32 = arith.constant 0 : i32
    %c0_i32_0 = arith.constant 0 : i32
    return %c0_i32, %arg0 : i32, i32
  }
}

</mosaic_0001>

<bundles_post_ra>
// kernel: tpu_custom_call.1
= control target key start
LH: loop header
LB: loop body
LE: loop exit
PB: predicated region body
PF: predicated region fallthrough
CT: control target
= control target key end

     0   :  { %vm45_vm0 = vcmask 261120   ;;  %s490_s0 = inlined_call_operand.vmem [shape: f32[128,32], index: 0, kind: input, shape index: {}]   ;;  %s491_s1 = inlined_call_operand.<no memory space> [shape: f32[1,1], index: 1, kind: input, shape index: {}]   ;;  %s492_s2 = inlined_call_operand.hbm [shape: bf16[32,128], index: 2, kind: output, shape index: {}]  }
   0x1   :  { %v325_v0 = vld [vmem:[%s490_s0] sm:$0xff]  ;;  %v330_v1 = vld [vmem:[%s490_s0 + $0x8] sm:$0xff]  ;;  %v335_v2 = vld [vmem:[%s490_s0 + $0x10] sm:$0xff] }
   0x2   :  { %v29_v3 = vmul.f32 %v325_v0, %v325_v0  ;;  %v30_v4 = vmul.f32 %v330_v1, %v330_v1  ;;  %v31_v5 = vmul.f32 %v335_v2, %v335_v2  ;;  %v346_v6 = vld [vmem:[%s490_s0 + $0x18] sm:$0xff]  ;;  %v353_v8 = vld [vmem:[%s490_s0 + $0x20] sm:$0xff]  ;;  %v358_v9 = vld [vmem:[%s490_s0 + $0x28] sm:$0xff] }
   0x3   :  { %v32_v7 = vmul.f32 %v346_v6, %v346_v6  ;;  %v33_v14 = vmul.f32 %v353_v8, %v353_v8  ;;  %v34_v15 = vmul.f32 %v358_v9, %v358_v9 }
   0x4   :  { %v46_v10 = vsel %vm45_vm0, %v29_v3, 0.0  ;;  %v52_v11 = vsel %vm45_vm0, %v31_v5, 0.0  ;;  %v49_v12 = vsel %vm45_vm0, %v30_v4, 0.0 }
   0x5   :  { %47 = vadd.xlane.f32.xlu0 %v46_v10  ;;  %53 = vadd.xlane.f32.xlu1 %v52_v11  ;;  %v55_v13 = vsel %vm45_vm0, %v32_v7, 0.0 }
   0x6   :  { %8 = vsyncpa [#allocation4], 0  ;;  %v371_v16 = vld [vmem:[%s490_s0 + $0x30] sm:$0xff]  ;;  %v376_v17 = vld [vmem:[%s490_s0 + $0x38] sm:$0xff]  ;;  %v58_v18 = vsel %vm45_vm0, %v33_v14, 0.0  ;;  %v61_v19 = vsel %vm45_vm0, %v34_v15, 0.0  ;;  %v453_v62 = vstv %s491_s1 }
   0x7   :  { %v35_v20 = vmul.f32 %v371_v16, %v371_v16  ;;  %v36_v21 = vmul.f32 %v376_v17, %v376_v17  ;;  %v387_v22 = vld [vmem:[%s490_s0 + $0x40] sm:$0xff]  ;;  %v392_v23 = vld [vmem:[%s490_s0 + $0x48] sm:$0xff]  ;;  %v403_v28 = vld [vmem:[%s490_s0 + $0x50] sm:$0xff]  ;;  %s304_s1 = smov [#allocation3]  }
   0x8   :  { %v37_v26 = vmul.f32 %v387_v22, %v387_v22  ;;  %v38_v27 = vmul.f32 %v392_v23, %v392_v23  ;;  %v408_v29 = vld [vmem:[%s490_s0 + $0x58] sm:$0xff]  ;;  %v39_v32 = vmul.f32 %v403_v28, %v403_v28  ;;  %v419_v34 = vld [vmem:[%s490_s0 + $0x60] sm:$0xff]  ;;  %v424_v35 = vld [vmem:[%s490_s0 + $0x68] sm:$0xff]  ;;  %s217_s14 = sshll.u32 %s304_s1, 4  ;;  %s218_s14 = int_to_ptr.vmem [resolvable:$true] %s217_s14 }
   0x9   :  { %50 = vadd.xlane.f32.xlu0 %v49_v12  ;;  %56 = vadd.xlane.f32.xlu1 %v55_v13  ;;  %v64_v24 = vsel %vm45_vm0, %v35_v20, 0.0  ;;  %v67_v25 = vsel %vm45_vm0, %v36_v21, 0.0  ;;  %v40_v33 = vmul.f32 %v408_v29, %v408_v29  ;;  %v41_v38 = vmul.f32 %v419_v34, %v419_v34  ;;  %v435_v40 = vld [vmem:[%s490_s0 + $0x70] sm:$0xff]  ;;  %v440_v41 = vld [vmem:[%s490_s0 + $0x78] sm:$0xff]  ;;  %s282_s15 = scalar_lea.vmem %s218_s14, 256  ;;  %p287_p1 = scmp.lt.s32.totalorder %s218_s14, %s218_s14 }
   0xa   :  { %v70_v30 = vsel %vm45_vm0, %v37_v26, 0.0  ;;  %v73_v31 = vsel %vm45_vm0, %v38_v27, 0.0  ;;  %v76_v36 = vsel %vm45_vm0, %v39_v32, 0.0  ;;  %v42_v39 = vmul.f32 %v424_v35, %v424_v35  ;;  %p283_p0 = scmp.ne.s32.totalorder %s218_s14, %s282_s15  ;;  %p288_p2 = scmp.lt.s32.totalorder %s282_s15, %s282_s15 }
   0xb   :  { %v79_v37 = vsel %vm45_vm0, %v40_v33, 0.0  ;;  %v82_v42 = vsel %vm45_vm0, %v41_v38, 0.0  ;;  %v43_v44 = vmul.f32 %v435_v40, %v435_v40  ;;  %v44_v45 = vmul.f32 %v440_v41, %v440_v41 }
   0xc   :  { %v85_v43 = vsel %vm45_vm0, %v42_v39, 0.0  ;;  %p289_p3 = por %p288_p2, %p287_p1 }
   0xd   :  { %59 = vadd.xlane.f32.xlu0 %v58_v18  ;;  %62 = vadd.xlane.f32.xlu1 %v61_v19  ;;  %v88_v46 = vsel %vm45_vm0, %v43_v44, 0.0  ;;  %v91_v47 = vsel %vm45_vm0, %v44_v45, 0.0 }
   0xe   :  { %p290_p4 = pnand %p289_p3, %p283_p0 }
  0x11   :  { %65 = vadd.xlane.f32.xlu0 %v64_v24  ;;  %68 = vadd.xlane.f32.xlu1 %v67_v25 }
  0x15   :  { %71 = vadd.xlane.f32.xlu0 %v70_v30  ;;  %74 = vadd.xlane.f32.xlu1 %v73_v31 }
  0x19   :  { %77 = vadd.xlane.f32.xlu0 %v76_v36  ;;  %80 = vadd.xlane.f32.xlu1 %v79_v37 }
  0x1d   :  { %83 = vadd.xlane.f32.xlu0 %v82_v42  ;;  %86 = vadd.xlane.f32.xlu1 %v85_v43 }
  0x21   :  { %89 = vadd.xlane.f32.xlu0 %v88_v46  ;;  %92 = vadd.xlane.f32.xlu1 %v91_v47 }
  0x8e   :  { %v48_v48 = vpop.xlane.xlu0 %47  ;;  %v54_v49 = vpop.xlane.xlu1 %53 }
  0x8f   :  { %v94_v50 = vmax.f32 %v48_v48, 1e-24  ;;  %v96_v51 = vmax.f32 %v54_v49, 1e-24 }
  0x91   :  { %250 = vrsqrt.f32 %v94_v50 }
  0x92   :  { %v51_v52 = vpop.xlane.xlu0 %50  ;;  %v57_v53 = vpop.xlane.xlu1 %56  ;;  %252 = vrsqrt.f32 %v96_v51 }
  0x93   :  { %v95_v54 = vmax.f32 %v51_v52, 1e-24  ;;  %v97_v55 = vmax.f32 %v57_v53, 1e-24 }
  0x95   :  { %254 = vrsqrt.f32 %v95_v54 }
  0x96   :  { %v60_v56 = vpop.xlane.xlu0 %59  ;;  %256 = vrsqrt.f32 %v97_v55  ;;  %v63_v58 = vpop.xlane.xlu1 %62 }
  0x97   :  { %v98_v57 = vmax.f32 %v60_v56, 1e-24  ;;  %v99_v59 = vmax.f32 %v63_v58, 1e-24 }
  0x99   :  { %258 = vrsqrt.f32 %v98_v57 }
  0x9a   :  { %v66_v60 = vpop.xlane.xlu0 %65  ;;  %260 = vrsqrt.f32 %v99_v59  ;;  %v69_v5 = vpop.xlane.xlu1 %68 }
  0x9b   :  { %v100_v3 = vmax.f32 %v66_v60, 1e-24  ;;  %v101_v12 = vmax.f32 %v69_v5, 1e-24 }
  0x9d   :  { %262 = vrsqrt.f32 %v100_v3 }
  0x9e   :  { %v251_v61 = vpop.eup %250  ;;  %v72_v15 = vpop.xlane.xlu0 %71  ;;  %264 = vrsqrt.f32 %v101_v12 }
  0x9f   :  { %v126_v63 = vmul.f32 %v251_v61, %v325_v0  ;;  %v253_v4 = vpop.eup %252  ;;  %v102_v19 = vmax.f32 %v72_v15, 1e-24  ;;  %v75_v24 = vpop.xlane.xlu1 %74 }
  0xa0   :  { %v128_v13 = vmul.f32 %v253_v4, %v335_v2  ;;  %v103_v25 = vmax.f32 %v75_v24, 1e-24 }
  0xa1   :  { %v144_v7 = vmul.f32 %v453_v62, %v126_v63  ;;  %266 = vrsqrt.f32 %v102_v19 }
  0xa2   :  { %v255_v10 = vpop.eup %254  ;;  %v146_v0 = vmul.f32 %v453_v62, %v128_v13  ;;  %v78_v27 = vpop.xlane.xlu0 %77  ;;  %268 = vrsqrt.f32 %v103_v25 }
  0xa3   :  { %160 = vxpose.xlu0.b32.start [1/16] (narrow) %v144_v7, 32  ;;  %v127_v11 = vmul.f32 %v255_v10, %v330_v1  ;;  %v257_v14 = vpop.eup %256  ;;  %v104_v31 = vmax.f32 %v78_v27, 1e-24 }
  0xa4   :  { %v129_v20 = vmul.f32 %v257_v14, %v346_v6  ;;  %v81_v6 = vpop.xlane.xlu1 %80 }
  0xa5   :  { %v145_v18 = vmul.f32 %v453_v62, %v127_v11  ;;  %270 = vrsqrt.f32 %v104_v31  ;;  %v105_v37 = vmax.f32 %v81_v6, 1e-24 }
  0xa6   :  { %v259_v21 = vpop.eup %258  ;;  %v147_v1 = vmul.f32 %v453_v62, %v129_v20 }
  0xa7   :  { %161 = vxpose.xlu0.b32.cont [2/16] (narrow) %v145_v18, 32  ;;  %v130_v2 = vmul.f32 %v259_v21, %v353_v8  ;;  %v261_v26 = vpop.eup %260  ;;  %v84_v8 = vpop.xlane.xlu0 %83  ;;  %272 = vrsqrt.f32 %v105_v37 }
  0xa8   :  { %v131_v32 = vmul.f32 %v261_v26, %v358_v9  ;;  %v106_v43 = vmax.f32 %v84_v8, 1e-24  ;;  %v87_v9 = vpop.xlane.xlu1 %86 }
  0xa9   :  { %v148_v30 = vmul.f32 %v453_v62, %v130_v2  ;;  %v107_v47 = vmax.f32 %v87_v9, 1e-24 }
  0xaa   :  { %v263_v33 = vpop.eup %262  ;;  %v149_v36 = vmul.f32 %v453_v62, %v131_v32  ;;  %274 = vrsqrt.f32 %v106_v43 }
  0xab   :  { %162 = vxpose.xlu0.b32.cont [3/16] (narrow) %v146_v0, 32  ;;  %v132_v38 = vmul.f32 %v263_v33, %v371_v16  ;;  %v265_v39 = vpop.eup %264  ;;  %v90_v16 = vpop.xlane.xlu0 %89  ;;  %276 = vrsqrt.f32 %v107_v47 }
  0xac   :  { %v133_v44 = vmul.f32 %v265_v39, %v376_v17  ;;  %v108_v51 = vmax.f32 %v90_v16, 1e-24  ;;  %v93_v17 = vpop.xlane.xlu1 %92 }
  0xad   :  { %v150_v42 = vmul.f32 %v453_v62, %v132_v38  ;;  %v109_v55 = vmax.f32 %v93_v17, 1e-24 }
  0xae   :  { %v267_v45 = vpop.eup %266  ;;  %v151_v46 = vmul.f32 %v453_v62, %v133_v44  ;;  %278 = vrsqrt.f32 %v108_v51 }
  0xaf   :  { %163 = vxpose.xlu0.b32.cont [4/16] (narrow) %v147_v1, 32  ;;  %v134_v48 = vmul.f32 %v267_v45, %v387_v22  ;;  %v269_v49 = vpop.eup %268  ;;  %280 = vrsqrt.f32 %v109_v55 }
  0xb0   :  { %v135_v52 = vmul.f32 %v269_v49, %v392_v23 }
  0xb1   :  { %v152_v50 = vmul.f32 %v453_v62, %v134_v48 }
  0xb2   :  { %v271_v53 = vpop.eup %270  ;;  %v153_v54 = vmul.f32 %v453_v62, %v135_v52 }
  0xb3   :  { %164 = vxpose.xlu0.b32.cont [5/16] (narrow) %v148_v30, 32  ;;  %v136_v56 = vmul.f32 %v271_v53, %v403_v28 }
  0xb4   :  { %v273_v57 = vpop.eup %272 }
  0xb5   :  { %v154_v22 = vmul.f32 %v453_v62, %v136_v56  ;;  %v137_v58 = vmul.f32 %v273_v57, %v408_v29 }
  0xb7   :  { %165 = vxpose.xlu0.b32.cont [6/16] (narrow) %v149_v36, 32  ;;  %v275_v59 = vpop.eup %274  ;;  %v155_v23 = vmul.f32 %v453_v62, %v137_v58 }
  0xb8   :  { %v138_v60 = vmul.f32 %v275_v59, %v419_v34  ;;  %v277_v61 = vpop.eup %276 }
  0xb9   :  { %v139_v3 = vmul.f32 %v277_v61, %v424_v35 }
  0xba   :  { %v156_v63 = vmul.f32 %v453_v62, %v138_v60 }
  0xbb   :  { %166 = vxpose.xlu0.b32.cont [7/16] (narrow) %v150_v42, 32  ;;  %v279_v28 = vpop.eup %278  ;;  %v157_v4 = vmul.f32 %v453_v62, %v139_v3 }
  0xbc   :  { %v140_v5 = vmul.f32 %v279_v28, %v435_v40  ;;  %v281_v7 = vpop.eup %280 }
  0xbd   :  { %v141_v10 = vmul.f32 %v281_v7, %v440_v41 }
  0xbe   :  { %v158_v29 = vmul.f32 %v453_v62, %v140_v5 }
  0xbf   :  { %167 = vxpose.xlu0.b32.cont [8/16] (narrow) %v151_v46, 32  ;;  %v159_v34 = vmul.f32 %v453_v62, %v141_v10 }
  0xc3   :  { %168 = vxpose.xlu0.b32.cont [9/16] (narrow) %v152_v50, 32 }
  0xc7   :  { %169 = vxpose.xlu0.b32.cont [10/16] (narrow) %v153_v54, 32 }
  0xcb   :  { %170 = vxpose.xlu0.b32.cont [11/16] (narrow) %v154_v22, 32 }
  0xcf   :  { %171 = vxpose.xlu0.b32.cont [12/16] (narrow) %v155_v23, 32 }
  0xd3   :  { %172 = vxpose.xlu0.b32.cont [13/16] (narrow) %v156_v63, 32 }
  0xd7   :  { %173 = vxpose.xlu0.b32.cont [14/16] (narrow) %v157_v4, 32 }
  0xdb   :  { %174 = vxpose.xlu0.b32.cont [15/16] (narrow) %v158_v29, 32 }
  0xdf   :  { %175 = vxpose.xlu0.b32.end [16/16] (narrow) %v159_v34, 32 }
 0x11f   :  { %v176_v11 = vpop.trf.xlu0 }
 0x123   :  { %v177_v12 = vpop.trf.xlu0 }
 0x124   :  { %v239_v13 = vpack.c.bf16 %v177_v12, %v176_v11 }
 0x126   :  { %240 = vst [vmem:[#allocation3] sm:$0xff] %v239_v13  }
 0x127   :  { %v178_v35 = vpop.trf.xlu0 }
 0x12b   :  { %v179_v14 = vpop.trf.xlu0 }
 0x12c   :  { %v244_v40 = vpack.c.bf16 %v179_v14, %v178_v35 }
 0x12e   :  { %246 = vst [vmem:[#allocation3 + $0x8] sm:$0xff] %v244_v40  }
 0x12f   :  { %293 = shalt.err (!%p290_p4)
}
 0x130   :  { %s305_s16 = smov 64   ;;  %s306_s17 = smov 4  }
 0x131   :  { %223 = dma.vmem_to_hbm [thread:$0]  %s218_s14, 256, %s492_s2, [#allocation4], %s305_s16, %s305_s16, %s306_s17  }
 0x132   :  { %302 = dma.done.wait [#allocation4], 256  }
 0x133   :  { %303 = vsyncadd [#allocation4], 4294967040 }
 0x134   :  { %227 = vsyncpa [#allocation4], 1 }

</bundles_post_ra>
